<compile_context>
chip_gen: v5e
topology: v5e:2x2
jax: 0.10.0
libtpu: 0.0.40
codegen_flags: <defaults>
</compile_context>

<pallas_src>
import functools

import jax
import jax.numpy as jnp
from jax.experimental import pallas as pl
from jax.experimental.pallas import tpu as pltpu


def _round_up(n, m):
    return ((n + m - 1) // m) * m


def idec_kernel(v, n_clusters,
                x_ref,
                w_e1, b_e1, w_e2, b_e2, w_e3, b_e3, w_z, b_z,
                w_d1, b_d1, w_d2, b_d2, w_d3, b_d3, w_xb, b_xb,
                cl_t_ref,
                xbar_ref, q_ref):
    def linear(h, w_ref, b_ref):
        # MXU matmul in the packed weight dtype (bf16), f32 accumulation.
        # Bias add / ReLU stay f32 on the VPU.
        return jnp.dot(h.astype(w_ref.dtype), w_ref[...],
                       preferred_element_type=jnp.float32) + b_ref[...]

    x = x_ref[...]

    # Encoder
    h1 = jnp.maximum(linear(x, w_e1, b_e1), 0.0)
    h2 = jnp.maximum(linear(h1, w_e2, b_e2), 0.0)
    h3 = jnp.maximum(linear(h2, w_e3, b_e3), 0.0)
    z = linear(h3, w_z, b_z)                                   # [tb, n_z] f32

    # Decoder
    d1 = jnp.maximum(linear(z, w_d1, b_d1), 0.0)
    d2 = jnp.maximum(linear(d1, w_d2, b_d2), 0.0)
    d3 = jnp.maximum(linear(d2, w_d3, b_d3), 0.0)
    xbar_ref[...] = linear(d3, w_xb, b_xb)                     # padded cols are exactly 0

    # Student-t soft assignment via matmul identity (pairwise term on the MXU).
    c_t = cl_t_ref[...]                                          # [n_z, Kp] f32
    zz = jnp.sum(z * z, axis=1, keepdims=True)                   # [tb, 1]
    cc = jnp.sum(c_t * c_t, axis=0, keepdims=True)               # [1, Kp]
    cross = jnp.dot(z, c_t, preferred_element_type=jnp.float32)  # [tb, Kp]
    dist2 = jnp.maximum(zz + cc - 2.0 * cross, 0.0)              # clamp cancellation

    if v == 1.0:
        # (1 + d)^(-1) exactly; EUP reciprocal instead of exp+log power.
        q = pl.reciprocal(1.0 + dist2, approx=True)
    else:
        q = jnp.exp((-(v + 1.0) * 0.5) * jnp.log1p(dist2 / v))

    kp = q.shape[-1]
    valid = jax.lax.broadcasted_iota(jnp.int32, (1, kp), 1) < n_clusters
    q = jnp.where(valid, q, 0.0)                                 # mask padded clusters
    q = q * pl.reciprocal(jnp.sum(q, axis=1, keepdims=True), approx=True)
    q_ref[...] = q


def pack_idec_params(params, clusters, param_dtype=jnp.bfloat16):
    """One-time packing (call OUTSIDE the hot path): transpose PyTorch [out, in]
    weights to [in, out], zero-pad the model-facing feature / cluster axes to
    lane multiples (128), and cast weights to the MXU dtype."""
    n_clusters, _ = clusters.shape
    n_input = params[0][0].shape[1]
    n_in_pad = _round_up(n_input, 128)
    kp = _round_up(n_clusters, 128)

    flat = []
    for i, (W, b) in enumerate(params):
        Wt = jnp.asarray(W, jnp.float32).T                     # [in, out]
        bb = jnp.asarray(b, jnp.float32)[None, :]              # [1, out]
        if i == 0:                                             # pad input rows with zeros
            Wt = jnp.pad(Wt, ((0, n_in_pad - n_input), (0, 0)))
        if i == len(params) - 1:                               # pad x_bar columns with zeros
            Wt = jnp.pad(Wt, ((0, 0), (0, n_in_pad - n_input)))
            bb = jnp.pad(bb, ((0, 0), (0, n_in_pad - n_input)))
        flat.append(Wt.astype(param_dtype))                    # weights in MXU dtype
        flat.append(bb)                                        # biases stay f32

    clusters_t = jnp.asarray(clusters, jnp.float32).T          # [n_z, K]
    clusters_t = jnp.pad(clusters_t, ((0, 0), (0, kp - n_clusters)))
    return tuple(flat), clusters_t


@functools.partial(jax.jit, static_argnames=("v", "n_clusters", "block_b"))
def idec_forward(x, flat_params, clusters_t, *, v=1.0, n_clusters, block_b=128):
    B, n_input = x.shape
    n_in_pad = flat_params[0].shape[0]          # padded feature width (multiple of 128)
    kp = clusters_t.shape[1]                    # padded cluster width (multiple of 128)

    b_pad0 = _round_up(B, 8)
    tb = min(_round_up(block_b, 8), b_pad0)     # batch tile (sublane-aligned)
    b_pad = _round_up(B, tb)

    xp = jnp.pad(x.astype(flat_params[0].dtype),
                 ((0, b_pad - B), (0, n_in_pad - n_input)))

    def const_spec(a):
        return pl.BlockSpec(a.shape, lambda i: (0, 0))          # resident across grid

    in_specs = [pl.BlockSpec((tb, n_in_pad), lambda i: (i, 0))]
    in_specs += [const_spec(a) for a in flat_params]
    in_specs += [const_spec(clusters_t)]

    out_specs = (pl.BlockSpec((tb, n_in_pad), lambda i: (i, 0)),
                 pl.BlockSpec((tb, kp), lambda i: (i, 0)))
    out_shape = (jax.ShapeDtypeStruct((b_pad, n_in_pad), jnp.float32),
                 jax.ShapeDtypeStruct((b_pad, kp), jnp.float32))

    xbar_p, q_p = pl.pallas_call(
        functools.partial(idec_kernel, float(v), int(n_clusters)),
        grid_spec=pltpu.PrefetchScalarGridSpec(
            num_scalar_prefetch=0,
            grid=(b_pad // tb,),
            in_specs=in_specs,
            out_specs=out_specs),
        out_shape=out_shape,
        compiler_params=pltpu.CompilerParams(
            dimension_semantics=("parallel",)),
    )(xp, *flat_params, clusters_t)

    return xbar_p[:B, :n_input], q_p[:B, :n_clusters]


def make_linear_params(key, n_in, n_out):
    # Deterministic PyTorch-like init: U(-1/sqrt(n_in), 1/sqrt(n_in)) for W [out, in] and b [out].
    k1, k2 = jax.random.split(key)
    bound = 1.0 / jnp.sqrt(jnp.asarray(n_in, jnp.float32))
    W = jax.random.uniform(k1, (n_out, n_in), jnp.float32, -bound, bound)
    b = jax.random.uniform(k2, (n_out,), jnp.float32, -bound, bound)
    return W, b


def jax_reference(x, params, clusters, v=1.0):
    # Pure-f32 reference matching the PyTorch IDEC forward.
    h = x
    z = None
    for i, (W, b) in enumerate(params):
        h = h @ W.T + b
        if i == 3:
            z = h                      # z_layer: no ReLU
        elif i != 7:                   # x_bar_layer: no ReLU
            h = jnp.maximum(h, 0.0)
    x_bar = h
    d2 = jnp.sum((z[:, None, :] - clusters[None, :, :]) ** 2, axis=2)
    q = jnp.power(1.0 + d2 / v, -(v + 1.0) / 2.0)
    q = q / jnp.sum(q, axis=1, keepdims=True)
    return x_bar, q


if __name__ == "__main__":
    # Small IDEC configuration
    n_input, n_z, n_clusters = 64, 16, 8
    n_enc_1, n_enc_2, n_enc_3 = 32, 32, 64
    n_dec_1, n_dec_2, n_dec_3 = 64, 32, 32
    B = 8
    v = 1.0

    key = jax.random.PRNGKey(0)
    keys = jax.random.split(key, 10)

    layer_dims = [
        (n_input, n_enc_1), (n_enc_1, n_enc_2), (n_enc_2, n_enc_3), (n_enc_3, n_z),
        (n_z, n_dec_1), (n_dec_1, n_dec_2), (n_dec_2, n_dec_3), (n_dec_3, n_input),
    ]
    params = [make_linear_params(keys[i], din, dout) for i, (din, dout) in enumerate(layer_dims)]

    # cluster_layer: xavier_normal_ on [n_clusters, n_z]
    xavier_std = jnp.sqrt(2.0 / (n_clusters + n_z))
    clusters = xavier_std * jax.random.normal(keys[8], (n_clusters, n_z), jnp.float32)

    x = jax.random.normal(keys[9], (B, n_input), jnp.float32)

    # Pack parameters once (transpose / pad / cast happen outside the hot path).
    flat_params, clusters_t = pack_idec_params(params, clusters, param_dtype=jnp.bfloat16)

    x_bar, q = idec_forward(x, flat_params, clusters_t, v=v, n_clusters=n_clusters)
    jax.block_until_ready((x_bar, q))

    x_bar_ref, q_ref = jax_reference(x, params, clusters, v=v)
    assert x_bar.shape == (B, n_input) and q.shape == (B, n_clusters)
    # bf16 matmul inputs + approx reciprocal -> compare against the f32 spec reference
    # with tolerances that still catch any semantic error.
    assert jnp.allclose(x_bar, x_bar_ref, rtol=5e-2, atol=2e-2), "x_bar mismatch"
    assert jnp.allclose(q, q_ref, rtol=5e-2, atol=1e-2), "q mismatch"

    print("KERNEL_OK")
</pallas_src>

<mosaic_0001>
module attributes {stable_mosaic.version = 11 : i64} {
  func.func @idec_kernel(%arg0: i32, %arg1: memref<8x128xbf16, #tpu.memory_space<vmem>>, %arg2: memref<128x32xbf16, #tpu.memory_space<vmem>>, %arg3: memref<1x32xf32, #tpu.memory_space<vmem>>, %arg4: memref<32x32xbf16, #tpu.memory_space<vmem>>, %arg5: memref<1x32xf32, #tpu.memory_space<vmem>>, %arg6: memref<32x64xbf16, #tpu.memory_space<vmem>>, %arg7: memref<1x64xf32, #tpu.memory_space<vmem>>, %arg8: memref<64x16xbf16, #tpu.memory_space<vmem>>, %arg9: memref<1x16xf32, #tpu.memory_space<vmem>>, %arg10: memref<16x64xbf16, #tpu.memory_space<vmem>>, %arg11: memref<1x64xf32, #tpu.memory_space<vmem>>, %arg12: memref<64x32xbf16, #tpu.memory_space<vmem>>, %arg13: memref<1x32xf32, #tpu.memory_space<vmem>>, %arg14: memref<32x32xbf16, #tpu.memory_space<vmem>>, %arg15: memref<1x32xf32, #tpu.memory_space<vmem>>, %arg16: memref<32x128xbf16, #tpu.memory_space<vmem>>, %arg17: memref<1x128xf32, #tpu.memory_space<vmem>>, %arg18: memref<16x128xf32, #tpu.memory_space<vmem>>, %arg19: memref<8x128xf32, #tpu.memory_space<vmem>>, %arg20: memref<8x128xf32, #tpu.memory_space<vmem>>) attributes {dimension_semantics = [#tpu.dimension_semantics<parallel>], iteration_bounds = array<i64: 1>, scalar_prefetch = 0 : i64, scratch_operands = 0 : i64, tpu.core_type = #tpu.core_type<tc>, window_params = [{transform_indices = @transform_0, window_bounds = array<i64: 8, 128>}, {pipeline_mode = #tpu.pipeline_mode<synchronous>, transform_indices = @transform_1, window_bounds = array<i64: 128, 32>}, {pipeline_mode = #tpu.pipeline_mode<synchronous>, transform_indices = @transform_2, window_bounds = array<i64: 1, 32>}, {pipeline_mode = #tpu.pipeline_mode<synchronous>, transform_indices = @transform_3, window_bounds = array<i64: 32, 32>}, {pipeline_mode = #tpu.pipeline_mode<synchronous>, transform_indices = @transform_4, window_bounds = array<i64: 1, 32>}, {pipeline_mode = #tpu.pipeline_mode<synchronous>, transform_indices = @transform_5, window_bounds = array<i64: 32, 64>}, {pipeline_mode = #tpu.pipeline_mode<synchronous>, transform_indices = @transform_6, window_bounds = array<i64: 1, 64>}, {pipeline_mode = #tpu.pipeline_mode<synchronous>, transform_indices = @transform_7, window_bounds = array<i64: 64, 16>}, {pipeline_mode = #tpu.pipeline_mode<synchronous>, transform_indices = @transform_8, window_bounds = array<i64: 1, 16>}, {pipeline_mode = #tpu.pipeline_mode<synchronous>, transform_indices = @transform_9, window_bounds = array<i64: 16, 64>}, {pipeline_mode = #tpu.pipeline_mode<synchronous>, transform_indices = @transform_10, window_bounds = array<i64: 1, 64>}, {pipeline_mode = #tpu.pipeline_mode<synchronous>, transform_indices = @transform_11, window_bounds = array<i64: 64, 32>}, {pipeline_mode = #tpu.pipeline_mode<synchronous>, transform_indices = @transform_12, window_bounds = array<i64: 1, 32>}, {pipeline_mode = #tpu.pipeline_mode<synchronous>, transform_indices = @transform_13, window_bounds = array<i64: 32, 32>}, {pipeline_mode = #tpu.pipeline_mode<synchronous>, transform_indices = @transform_14, window_bounds = array<i64: 1, 32>}, {pipeline_mode = #tpu.pipeline_mode<synchronous>, transform_indices = @transform_15, window_bounds = array<i64: 32, 128>}, {pipeline_mode = #tpu.pipeline_mode<synchronous>, transform_indices = @transform_16, window_bounds = array<i64: 1, 128>}, {pipeline_mode = #tpu.pipeline_mode<synchronous>, transform_indices = @transform_17, window_bounds = array<i64: 16, 128>}, {transform_indices = @transform_18, window_bounds = array<i64: 8, 128>}, {transform_indices = @transform_19, window_bounds = array<i64: 8, 128>}]} {
    %c0 = arith.constant 0 : index
    %c0_0 = arith.constant 0 : index
    %0 = vector.load %arg1[%c0, %c0_0] : memref<8x128xbf16, #tpu.memory_space<vmem>>, vector<8x128xbf16>
    %c0_1 = arith.constant 0 : index
    %c0_2 = arith.constant 0 : index
    %1 = vector.load %arg2[%c0_1, %c0_2] : memref<128x32xbf16, #tpu.memory_space<vmem>>, vector<128x32xbf16>
    %cst = arith.constant dense<0.000000e+00> : vector<8x32xf32>
    %2 = tpu.matmul %0, %1, %cst {dimension_numbers = #tpu.dot_dimension_numbers<[1], [0], [0], [1], [0, 0, 1, 1], [], []>} : vector<8x128xbf16>, vector<128x32xbf16>, vector<8x32xf32> -> vector<8x32xf32>
    %c0_3 = arith.constant 0 : index
    %c0_4 = arith.constant 0 : index
    %3 = vector.load %arg3[%c0_3, %c0_4] : memref<1x32xf32, #tpu.memory_space<vmem>>, vector<1x32xf32>
    %4 = vector.broadcast %3 : vector<1x32xf32> to vector<8x32xf32>
    %5 = arith.addf %2, %4 : vector<8x32xf32>
    %cst_5 = arith.constant 0.000000e+00 : f32
    %6 = vector.broadcast %cst_5 : f32 to vector<8x32xf32>
    %7 = arith.maximumf %5, %6 : vector<8x32xf32>
    %8 = arith.truncf %7 : vector<8x32xf32> to vector<8x32xbf16>
    %c0_6 = arith.constant 0 : index
    %c0_7 = arith.constant 0 : index
    %9 = vector.load %arg4[%c0_6, %c0_7] : memref<32x32xbf16, #tpu.memory_space<vmem>>, vector<32x32xbf16>
    %cst_8 = arith.constant dense<0.000000e+00> : vector<8x32xf32>
    %10 = tpu.matmul %8, %9, %cst_8 {dimension_numbers = #tpu.dot_dimension_numbers<[1], [0], [0], [1], [0, 0, 1, 1], [], []>} : vector<8x32xbf16>, vector<32x32xbf16>, vector<8x32xf32> -> vector<8x32xf32>
    %c0_9 = arith.constant 0 : index
    %c0_10 = arith.constant 0 : index
    %11 = vector.load %arg5[%c0_9, %c0_10] : memref<1x32xf32, #tpu.memory_space<vmem>>, vector<1x32xf32>
    %12 = vector.broadcast %11 : vector<1x32xf32> to vector<8x32xf32>
    %13 = arith.addf %10, %12 : vector<8x32xf32>
    %cst_11 = arith.constant 0.000000e+00 : f32
    %14 = vector.broadcast %cst_11 : f32 to vector<8x32xf32>
    %15 = arith.maximumf %13, %14 : vector<8x32xf32>
    %16 = arith.truncf %15 : vector<8x32xf32> to vector<8x32xbf16>
    %c0_12 = arith.constant 0 : index
    %c0_13 = arith.constant 0 : index
    %17 = vector.load %arg6[%c0_12, %c0_13] : memref<32x64xbf16, #tpu.memory_space<vmem>>, vector<32x64xbf16>
    %cst_14 = arith.constant dense<0.000000e+00> : vector<8x64xf32>
    %18 = tpu.matmul %16, %17, %cst_14 {dimension_numbers = #tpu.dot_dimension_numbers<[1], [0], [0], [1], [0, 0, 1, 1], [], []>} : vector<8x32xbf16>, vector<32x64xbf16>, vector<8x64xf32> -> vector<8x64xf32>
    %c0_15 = arith.constant 0 : index
    %c0_16 = arith.constant 0 : index
    %19 = vector.load %arg7[%c0_15, %c0_16] : memref<1x64xf32, #tpu.memory_space<vmem>>, vector<1x64xf32>
    %20 = vector.broadcast %19 : vector<1x64xf32> to vector<8x64xf32>
    %21 = arith.addf %18, %20 : vector<8x64xf32>
    %cst_17 = arith.constant 0.000000e+00 : f32
    %22 = vector.broadcast %cst_17 : f32 to vector<8x64xf32>
    %23 = arith.maximumf %21, %22 : vector<8x64xf32>
    %24 = arith.truncf %23 : vector<8x64xf32> to vector<8x64xbf16>
    %c0_18 = arith.constant 0 : index
    %c0_19 = arith.constant 0 : index
    %25 = vector.load %arg8[%c0_18, %c0_19] : memref<64x16xbf16, #tpu.memory_space<vmem>>, vector<64x16xbf16>
    %cst_20 = arith.constant dense<0.000000e+00> : vector<8x16xf32>
    %26 = tpu.matmul %24, %25, %cst_20 {dimension_numbers = #tpu.dot_dimension_numbers<[1], [0], [0], [1], [0, 0, 1, 1], [], []>} : vector<8x64xbf16>, vector<64x16xbf16>, vector<8x16xf32> -> vector<8x16xf32>
    %c0_21 = arith.constant 0 : index
    %c0_22 = arith.constant 0 : index
    %27 = vector.load %arg9[%c0_21, %c0_22] : memref<1x16xf32, #tpu.memory_space<vmem>>, vector<1x16xf32>
    %28 = vector.broadcast %27 : vector<1x16xf32> to vector<8x16xf32>
    %29 = arith.addf %26, %28 : vector<8x16xf32>
    %30 = arith.truncf %29 : vector<8x16xf32> to vector<8x16xbf16>
    %c0_23 = arith.constant 0 : index
    %c0_24 = arith.constant 0 : index
    %31 = vector.load %arg10[%c0_23, %c0_24] : memref<16x64xbf16, #tpu.memory_space<vmem>>, vector<16x64xbf16>
    %cst_25 = arith.constant dense<0.000000e+00> : vector<8x64xf32>
    %32 = tpu.matmul %30, %31, %cst_25 {dimension_numbers = #tpu.dot_dimension_numbers<[1], [0], [0], [1], [0, 0, 1, 1], [], []>} : vector<8x16xbf16>, vector<16x64xbf16>, vector<8x64xf32> -> vector<8x64xf32>
    %c0_26 = arith.constant 0 : index
    %c0_27 = arith.constant 0 : index
    %33 = vector.load %arg11[%c0_26, %c0_27] : memref<1x64xf32, #tpu.memory_space<vmem>>, vector<1x64xf32>
    %34 = vector.broadcast %33 : vector<1x64xf32> to vector<8x64xf32>
    %35 = arith.addf %32, %34 : vector<8x64xf32>
    %cst_28 = arith.constant 0.000000e+00 : f32
    %36 = vector.broadcast %cst_28 : f32 to vector<8x64xf32>
    %37 = arith.maximumf %35, %36 : vector<8x64xf32>
    %38 = arith.truncf %37 : vector<8x64xf32> to vector<8x64xbf16>
    %c0_29 = arith.constant 0 : index
    %c0_30 = arith.constant 0 : index
    %39 = vector.load %arg12[%c0_29, %c0_30] : memref<64x32xbf16, #tpu.memory_space<vmem>>, vector<64x32xbf16>
    %cst_31 = arith.constant dense<0.000000e+00> : vector<8x32xf32>
    %40 = tpu.matmul %38, %39, %cst_31 {dimension_numbers = #tpu.dot_dimension_numbers<[1], [0], [0], [1], [0, 0, 1, 1], [], []>} : vector<8x64xbf16>, vector<64x32xbf16>, vector<8x32xf32> -> vector<8x32xf32>
    %c0_32 = arith.constant 0 : index
    %c0_33 = arith.constant 0 : index
    %41 = vector.load %arg13[%c0_32, %c0_33] : memref<1x32xf32, #tpu.memory_space<vmem>>, vector<1x32xf32>
    %42 = vector.broadcast %41 : vector<1x32xf32> to vector<8x32xf32>
    %43 = arith.addf %40, %42 : vector<8x32xf32>
    %cst_34 = arith.constant 0.000000e+00 : f32
    %44 = vector.broadcast %cst_34 : f32 to vector<8x32xf32>
    %45 = arith.maximumf %43, %44 : vector<8x32xf32>
    %46 = arith.truncf %45 : vector<8x32xf32> to vector<8x32xbf16>
    %c0_35 = arith.constant 0 : index
    %c0_36 = arith.constant 0 : index
    %47 = vector.load %arg14[%c0_35, %c0_36] : memref<32x32xbf16, #tpu.memory_space<vmem>>, vector<32x32xbf16>
    %cst_37 = arith.constant dense<0.000000e+00> : vector<8x32xf32>
    %48 = tpu.matmul %46, %47, %cst_37 {dimension_numbers = #tpu.dot_dimension_numbers<[1], [0], [0], [1], [0, 0, 1, 1], [], []>} : vector<8x32xbf16>, vector<32x32xbf16>, vector<8x32xf32> -> vector<8x32xf32>
    %c0_38 = arith.constant 0 : index
    %c0_39 = arith.constant 0 : index
    %49 = vector.load %arg15[%c0_38, %c0_39] : memref<1x32xf32, #tpu.memory_space<vmem>>, vector<1x32xf32>
    %50 = vector.broadcast %49 : vector<1x32xf32> to vector<8x32xf32>
    %51 = arith.addf %48, %50 : vector<8x32xf32>
    %cst_40 = arith.constant 0.000000e+00 : f32
    %52 = vector.broadcast %cst_40 : f32 to vector<8x32xf32>
    %53 = arith.maximumf %51, %52 : vector<8x32xf32>
    %54 = arith.truncf %53 : vector<8x32xf32> to vector<8x32xbf16>
    %c0_41 = arith.constant 0 : index
    %c0_42 = arith.constant 0 : index
    %55 = vector.load %arg16[%c0_41, %c0_42] : memref<32x128xbf16, #tpu.memory_space<vmem>>, vector<32x128xbf16>
    %cst_43 = arith.constant dense<0.000000e+00> : vector<8x128xf32>
    %56 = tpu.matmul %54, %55, %cst_43 {dimension_numbers = #tpu.dot_dimension_numbers<[1], [0], [0], [1], [0, 0, 1, 1], [], []>} : vector<8x32xbf16>, vector<32x128xbf16>, vector<8x128xf32> -> vector<8x128xf32>
    %c0_44 = arith.constant 0 : index
    %c0_45 = arith.constant 0 : index
    %57 = vector.load %arg17[%c0_44, %c0_45] : memref<1x128xf32, #tpu.memory_space<vmem>>, vector<1x128xf32>
    %58 = vector.broadcast %57 : vector<1x128xf32> to vector<8x128xf32>
    %59 = arith.addf %56, %58 : vector<8x128xf32>
    %c0_46 = arith.constant 0 : index
    %c0_47 = arith.constant 0 : index
    %60 = vector.load %arg19[%c0_46, %c0_47] : memref<8x128xf32, #tpu.memory_space<vmem>>, vector<8x128xf32>
    tpu.vector_store %arg19[%c0_46, %c0_47], %59 {strides = array<i32>} : memref<8x128xf32, #tpu.memory_space<vmem>>, vector<8x128xf32>,
    %c0_48 = arith.constant 0 : index
    %c0_49 = arith.constant 0 : index
    %61 = vector.load %arg18[%c0_48, %c0_49] : memref<16x128xf32, #tpu.memory_space<vmem>>, vector<16x128xf32>
    %62 = arith.mulf %29, %29 : vector<8x16xf32>
    %cst_50 = arith.constant dense<0.000000e+00> : vector<8xf32>
    %63 = vector.multi_reduction <add>, %62, %cst_50 [1] : vector<8x16xf32> to vector<8xf32>
    %64 = vector.shape_cast %63 : vector<8xf32> to vector<8x1xf32>
    %65 = arith.mulf %61, %61 : vector<16x128xf32>
    %cst_51 = arith.constant dense<0.000000e+00> : vector<128xf32>
    %66 = vector.multi_reduction <add>, %65, %cst_51 [0] : vector<16x128xf32> to vector<128xf32>
    %67 = vector.shape_cast %66 : vector<128xf32> to vector<1x128xf32>
    %cst_52 = arith.constant dense<0.000000e+00> : vector<8x128xf32>
    %68 = tpu.matmul %29, %61, %cst_52 {dimension_numbers = #tpu.dot_dimension_numbers<[1], [0], [0], [1], [0, 0, 1, 1], [], []>} : vector<8x16xf32>, vector<16x128xf32>, vector<8x128xf32> -> vector<8x128xf32>
    %69 = vector.broadcast %64 : vector<8x1xf32> to vector<8x128xf32>
    %70 = vector.broadcast %67 : vector<1x128xf32> to vector<8x128xf32>
    %71 = arith.addf %69, %70 : vector<8x128xf32>
    %cst_53 = arith.constant 2.000000e+00 : f32
    %72 = vector.broadcast %cst_53 : f32 to vector<8x128xf32>
    %73 = arith.mulf %72, %68 : vector<8x128xf32>
    %74 = arith.subf %71, %73 : vector<8x128xf32>
    %cst_54 = arith.constant 0.000000e+00 : f32
    %75 = vector.broadcast %cst_54 : f32 to vector<8x128xf32>
    %76 = arith.maximumf %74, %75 : vector<8x128xf32>
    %cst_55 = arith.constant 1.000000e+00 : f32
    %77 = vector.broadcast %cst_55 : f32 to vector<8x128xf32>
    %78 = arith.addf %77, %76 : vector<8x128xf32>
    %79 = tpu.reciprocal %78 {approx = true} : vector<8x128xf32> -> vector<8x128xf32>
    %80 = tpu.iota {dimensions = array<i32: 1>} : vector<1x128xi32>
    %c8_i32 = arith.constant 8 : i32
    %81 = vector.broadcast %c8_i32 : i32 to vector<1x128xi32>
    %82 = arith.cmpi slt, %80, %81 : vector<1x128xi32>
    %cst_56 = arith.constant 0.000000e+00 : f32
    %83 = vector.shape_cast %82 : vector<1x128xi1> to vector<1x128xi1>
    %84 = vector.broadcast %83 : vector<1x128xi1> to vector<8x128xi1>
    %85 = vector.broadcast %cst_56 : f32 to vector<8x128xf32>
    %86 = arith.select %84, %79, %85 : vector<8x128xi1>, vector<8x128xf32>
    %cst_57 = arith.constant dense<0.000000e+00> : vector<8xf32>
    %87 = vector.multi_reduction <add>, %86, %cst_57 [1] : vector<8x128xf32> to vector<8xf32>
    %88 = vector.shape_cast %87 : vector<8xf32> to vector<8x1xf32>
    %89 = tpu.reciprocal %88 {approx = true} : vector<8x1xf32> -> vector<8x1xf32>
    %90 = vector.broadcast %89 : vector<8x1xf32> to vector<8x128xf32>
    %91 = arith.mulf %86, %90 : vector<8x128xf32>
    %c0_58 = arith.constant 0 : index
    %c0_59 = arith.constant 0 : index
    %92 = vector.load %arg20[%c0_58, %c0_59] : memref<8x128xf32, #tpu.memory_space<vmem>>, vector<8x128xf32>
    tpu.vector_store %arg20[%c0_58, %c0_59], %91 {strides = array<i32>} : memref<8x128xf32, #tpu.memory_space<vmem>>, vector<8x128xf32>,
    return
  }
  func.func @transform_0(%arg0: i32) -> (i32, i32) {
    %c0_i32 = arith.constant 0 : i32
    %c0_i32_0 = arith.constant 0 : i32
    return %arg0, %c0_i32 : i32, i32
  }
  func.func @transform_1(%arg0: i32) -> (i32, i32) {
    %c0_i32 = arith.constant 0 : i32
    %c0_i32_0 = arith.constant 0 : i32
    %c0_i32_1 = arith.constant 0 : i32
    return %c0_i32, %c0_i32_0 : i32, i32
  }
  func.func @transform_2(%arg0: i32) -> (i32, i32) {
    %c0_i32 = arith.constant 0 : i32
    %c0_i32_0 = arith.constant 0 : i32
    %c0_i32_1 = arith.constant 0 : i32
    return %c0_i32, %c0_i32_0 : i32, i32
  }
  func.func @transform_3(%arg0: i32) -> (i32, i32) {
    %c0_i32 = arith.constant 0 : i32
    %c0_i32_0 = arith.constant 0 : i32
    %c0_i32_1 = arith.constant 0 : i32
    return %c0_i32, %c0_i32_0 : i32, i32
  }
  func.func @transform_4(%arg0: i32) -> (i32, i32) {
    %c0_i32 = arith.constant 0 : i32
    %c0_i32_0 = arith.constant 0 : i32
    %c0_i32_1 = arith.constant 0 : i32
    return %c0_i32, %c0_i32_0 : i32, i32
  }
  func.func @transform_5(%arg0: i32) -> (i32, i32) {
    %c0_i32 = arith.constant 0 : i32
    %c0_i32_0 = arith.constant 0 : i32
    %c0_i32_1 = arith.constant 0 : i32
    return %c0_i32, %c0_i32_0 : i32, i32
  }
  func.func @transform_6(%arg0: i32) -> (i32, i32) {
    %c0_i32 = arith.constant 0 : i32
    %c0_i32_0 = arith.constant 0 : i32
    %c0_i32_1 = arith.constant 0 : i32
    return %c0_i32, %c0_i32_0 : i32, i32
  }
  func.func @transform_7(%arg0: i32) -> (i32, i32) {
    %c0_i32 = arith.constant 0 : i32
    %c0_i32_0 = arith.constant 0 : i32
    %c0_i32_1 = arith.constant 0 : i32
    return %c0_i32, %c0_i32_0 : i32, i32
  }
  func.func @transform_8(%arg0: i32) -> (i32, i32) {
    %c0_i32 = arith.constant 0 : i32
    %c0_i32_0 = arith.constant 0 : i32
    %c0_i32_1 = arith.constant 0 : i32
    return %c0_i32, %c0_i32_0 : i32, i32
  }
  func.func @transform_9(%arg0: i32) -> (i32, i32) {
    %c0_i32 = arith.constant 0 : i32
    %c0_i32_0 = arith.constant 0 : i32
    %c0_i32_1 = arith.constant 0 : i32
    return %c0_i32, %c0_i32_0 : i32, i32
  }
  func.func @transform_10(%arg0: i32) -> (i32, i32) {
    %c0_i32 = arith.constant 0 : i32
    %c0_i32_0 = arith.constant 0 : i32
    %c0_i32_1 = arith.constant 0 : i32
    return %c0_i32, %c0_i32_0 : i32, i32
  }
  func.func @transform_11(%arg0: i32) -> (i32, i32) {
    %c0_i32 = arith.constant 0 : i32
    %c0_i32_0 = arith.constant 0 : i32
    %c0_i32_1 = arith.constant 0 : i32
    return %c0_i32, %c0_i32_0 : i32, i32
  }
  func.func @transform_12(%arg0: i32) -> (i32, i32) {
    %c0_i32 = arith.constant 0 : i32
    %c0_i32_0 = arith.constant 0 : i32
    %c0_i32_1 = arith.constant 0 : i32
    return %c0_i32, %c0_i32_0 : i32, i32
  }
  func.func @transform_13(%arg0: i32) -> (i32, i32) {
    %c0_i32 = arith.constant 0 : i32
    %c0_i32_0 = arith.constant 0 : i32
    %c0_i32_1 = arith.constant 0 : i32
    return %c0_i32, %c0_i32_0 : i32, i32
  }
  func.func @transform_14(%arg0: i32) -> (i32, i32) {
    %c0_i32 = arith.constant 0 : i32
    %c0_i32_0 = arith.constant 0 : i32
    %c0_i32_1 = arith.constant 0 : i32
    return %c0_i32, %c0_i32_0 : i32, i32
  }
  func.func @transform_15(%arg0: i32) -> (i32, i32) {
    %c0_i32 = arith.constant 0 : i32
    %c0_i32_0 = arith.constant 0 : i32
    %c0_i32_1 = arith.constant 0 : i32
    return %c0_i32, %c0_i32_0 : i32, i32
  }
  func.func @transform_16(%arg0: i32) -> (i32, i32) {
    %c0_i32 = arith.constant 0 : i32
    %c0_i32_0 = arith.constant 0 : i32
    %c0_i32_1 = arith.constant 0 : i32
    return %c0_i32, %c0_i32_0 : i32, i32
  }
  func.func @transform_17(%arg0: i32) -> (i32, i32) {
    %c0_i32 = arith.constant 0 : i32
    %c0_i32_0 = arith.constant 0 : i32
    %c0_i32_1 = arith.constant 0 : i32
    return %c0_i32, %c0_i32_0 : i32, i32
  }
  func.func @transform_18(%arg0: i32) -> (i32, i32) {
    %c0_i32 = arith.constant 0 : i32
    %c0_i32_0 = arith.constant 0 : i32
    return %arg0, %c0_i32 : i32, i32
  }
  func.func @transform_19(%arg0: i32) -> (i32, i32) {
    %c0_i32 = arith.constant 0 : i32
    %c0_i32_0 = arith.constant 0 : i32
    return %arg0, %c0_i32 : i32, i32
  }
}

</mosaic_0001>

<bundles_post_ra>
// kernel: idec_forward.1
= control target key start
LH: loop header
LB: loop body
LE: loop exit
PB: predicated region body
PF: predicated region fallthrough
CT: control target
= control target key end

     0   :  { %s950_s0 = inlined_call_operand.vmem [shape: bf16[8,128], index: 0, kind: input, shape index: {}]   ;;  %s951_s1 = inlined_call_operand.vmem [shape: bf16[128,32], index: 1, kind: input, shape index: {}]   ;;  %s952_s2 = inlined_call_operand.vmem [shape: f32[1,32], index: 2, kind: input, shape index: {}]   ;;  %s953_s3 = inlined_call_operand.vmem [shape: bf16[32,32], index: 3, kind: input, shape index: {}]   ;;  %s954_s4 = inlined_call_operand.vmem [shape: f32[1,32], index: 4, kind: input, shape index: {}]   ;;  %s955_s5 = inlined_call_operand.vmem [shape: bf16[32,64], index: 5, kind: input, shape index: {}]   ;;  %s956_s6 = inlined_call_operand.vmem [shape: f32[1,64], index: 6, kind: input, shape index: {}]   ;;  %s957_s7 = inlined_call_operand.vmem [shape: bf16[64,16], index: 7, kind: input, shape index: {}]   ;;  %s958_s8 = inlined_call_operand.vmem [shape: f32[1,16], index: 8, kind: input, shape index: {}]   ;;  %s959_s9 = inlined_call_operand.vmem [shape: bf16[16,64], index: 9, kind: input, shape index: {}]   ;;  %s960_s10 = inlined_call_operand.vmem [shape: f32[1,64], index: 10, kind: input, shape index: {}]   ;;  %s961_s11 = inlined_call_operand.vmem [shape: bf16[64,32], index: 11, kind: input, shape index: {}]   ;;  %s962_s12 = inlined_call_operand.vmem [shape: f32[1,32], index: 12, kind: input, shape index: {}]   ;;  %s963_s13 = inlined_call_operand.vmem [shape: bf16[32,32], index: 13, kind: input, shape index: {}]   ;;  %s964_s14 = inlined_call_operand.vmem [shape: f32[1,32], index: 14, kind: input, shape index: {}]   ;;  %s965_s15 = inlined_call_operand.vmem [shape: bf16[32,128], index: 15, kind: input, shape index: {}]   ;;  %s966_s16 = inlined_call_operand.vmem [shape: f32[1,128], index: 16, kind: input, shape index: {}]   ;;  %s967_s17 = inlined_call_operand.vmem [shape: f32[16,128], index: 17, kind: input, shape index: {}]   ;;  %s968_s18 = inlined_call_operand.hbm [shape: f32[8,128], index: 18, kind: output, shape index: {0}]   ;;  %s969_s19 = inlined_call_operand.hbm [shape: f32[8,128], index: 19, kind: output, shape index: {1}]  }
   0x1   :  { %972 = sst [smem:[#allocation8_spill]] %s950_s0 }
   0x2   :  { %973 = sst [smem:[#allocation9_spill]] %s951_s1 }
   0x3   :  { %974 = sst [smem:[#allocation10_spill]] %s952_s2 }
   0x4   :  { %975 = sst [smem:[#allocation11_spill]] %s953_s3 }
   0x5   :  { %25 = vsyncpa [#allocation3], 0  ;;  %s976_s20 = sld [smem:[#allocation9_spill]] }
   0xb   :  { %v641_v0 = vld [vmem:[%s976_s20 + $0x38] sm:$0xff]  ;;  %v640_v1 = vld [vmem:[%s976_s20 + $0x30] sm:$0xff]  ;;  %v639_v2 = vld [vmem:[%s976_s20 + $0x28] sm:$0xff] }
   0xc   :  { %133 = vmatpush.bf16.msra.mxu0 %v641_v0 }
  0x10   :  { %134 = vmatpush.bf16.msra.mxu0 %v640_v1 }
  0x11   :  { %26 = vsyncpa [#allocation5], 0  ;;  %v638_v3 = vld [vmem:[%s976_s20 + $0x20] sm:$0xff]  ;;  %v637_v4 = vld [vmem:[%s976_s20 + $0x18] sm:$0xff]  ;;  %s977_s22 = sld [smem:[#allocation8_spill]]  ;;  %vm168_vm0 = vcmask 261120  }
  0x12   :  { %v636_v5 = vld [vmem:[%s976_s20 + $0x10] sm:$0xff]  ;;  %v635_v6 = vld [vmem:[%s976_s20 + $0x8] sm:$0xff]  ;;  %v634_v7 = vld [vmem:[%s976_s20] sm:$0xff]  ;;  %s978_s24 = sld [smem:[#allocation11_spill]]  ;;  %vm261_vm1 = vcmask 523264   ;;  %vm291_vm2 = vcmask 130048  }
  0x13   :  { %s979_s28 = sld [smem:[#allocation10_spill]]  ;;  %v645_v17 = vld [vmem:[%s955_s5 + $0x8] sm:$0xff]  ;;  %v644_v18 = vld [vmem:[%s955_s5] sm:$0xff]  ;;  %v649_v19 = vld [vmem:[%s957_s7 + $0x18] sm:$0xff]  ;;  %s512_s30 = sshll.u32 %s969_s19, 4  ;;  %s513_s30 = int_to_ptr.hbm [resolvable:$true] %s512_s30 }
  0x14   :  { %135 = vmatpush.bf16.msra.mxu0 %v639_v2  ;;  %216 = vmatpush.bf16.msra.mxu2 %v645_v17  ;;  %v648_v20 = vld [vmem:[%s957_s7 + $0x10] sm:$0xff]  ;;  %v662_v21 = vld [vmem:[%s954_s4] ss:$0 sm:$0xff]  ;;  %v647_v27 = vld [vmem:[%s957_s7 + $0x8] sm:$0xff]  ;;  %s726_s1 = smov [#allocation2]   ;;  %s501_s23 = sshll.u32 %s968_s18, 4  ;;  %s502_s23 = int_to_ptr.hbm [resolvable:$true] %s501_s23 }
  0x15   :  { %269 = vmatpush.bf16.msra.mxu3 %v649_v19  ;;  %v646_v28 = vld [vmem:[%s957_s7] sm:$0xff]  ;;  %v654_v36 = vld [vmem:[%s961_s11 + $0x18] sm:$0xff]  ;;  %v653_v44 = vld [vmem:[%s961_s11 + $0x10] sm:$0xff]  ;;  %s725_s7 = smov [#allocation4]  }
  0x16   :  { %v650_v29 = vld [vmem:[%s959_s9] sm:$0xff]  ;;  %v652_v45 = vld [vmem:[%s961_s11 + $0x8] sm:$0xff]  ;;  %s510_s0 = sshll.u32 %s725_s7, 4  ;;  %s511_s0 = int_to_ptr.vmem [resolvable:$true] %s510_s0 }
  0x17   :  { %v64_v8 = vld [vmem:[%s977_s22] sm:$0xf]  ;;  %v440_v47 = vld [vmem:[%s967_s17 + $0x8] sm:$0xff] }
  0x18   :  { %136 = vmatpush.bf16.msra.mxu0 %v638_v3  ;;  %v643_v9 = vld [vmem:[%s978_s24 + $0x8] sm:$0xff]  ;;  %v642_v10 = vld [vmem:[%s978_s24] sm:$0xff]  ;;  %217 = vmatpush.bf16.msra.mxu2 %v644_v18  ;;  %v446_v58 = vmul.f32 %v440_v47, %v440_v47 }
  0x19   :  { %178 = vmatpush.bf16.msra.mxu1 %v643_v9  ;;  %v661_v11 = vld [vmem:[%s979_s28] ss:$0 sm:$0xff]  ;;  %270 = vmatpush.bf16.msra.mxu3 %v648_v20  ;;  %v656_v49 = vld [vmem:[%s963_s13 + $0x8] sm:$0xff] }
  0x1a   :  { %v663_v30 = vld [vmem:[%s956_s6] ss:$0 sm:$0xff]  ;;  %v658_v2 = vld [vmem:[%s965_s15 + $0x8] sm:$0xff] }
  0x1b   :  { %v664_v37 = vld [vmem:[%s958_s8] ss:$0 sm:$0xff]  ;;  %s499_s8 = sshll.u32 %s726_s1, 4  ;;  %s500_s8 = int_to_ptr.vmem [resolvable:$true] %s499_s8 }
  0x1c   :  { %137 = vmatpush.bf16.msra.mxu0 %v637_v4  ;;  %353 = vmatpush.bf16.msrb.mxu2 %v654_v36  ;;  %v651_v46 = vld [vmem:[%s961_s11] sm:$0xff] }
  0x1d   :  { %179 = vmatpush.bf16.msra.mxu1 %v642_v10  ;;  %271 = vmatpush.bf16.msra.mxu3 %v647_v27  ;;  %v439_v48 = vld [vmem:[%s967_s17] sm:$0xff] }
  0x1e   :  { %v655_v50 = vld [vmem:[%s963_s13] sm:$0xff]  ;;  %v445_v57 = vmul.f32 %v439_v48, %v439_v48 }
  0x1f   :  { %v665_v51 = vld [vmem:[%s960_s10] ss:$0 sm:$0xff] }
  0x20   :  { %138 = vmatpush.bf16.msra.mxu0 %v636_v5  ;;  %354 = vmatpush.bf16.msrb.mxu2 %v653_v44  ;;  %v447_v59 = vadd.f32 %v446_v58, %v445_v57  ;;  %v666_v62 = vld [vmem:[%s962_s12] ss:$0 sm:$0xff] }
  0x21   :  { %272 = vmatpush.bf16.msra.mxu3 %v646_v28  ;;  %302 = vmatpush.bf16.msrb.mxu1 %v650_v29  ;;  %v657_v4 = vld [vmem:[%s965_s15] sm:$0xff] }
  0x22   :  { %v448_v60 = vrot.slane %v447_v59, 4 }
  0x24   :  { %139 = vmatpush.bf16.msra.mxu0 %v635_v6  ;;  %355 = vmatpush.bf16.msrb.mxu2 %v652_v45  ;;  %v449_v61 = vadd.f32 %v448_v60, %v447_v59 }
  0x25   :  { %393 = vmatpush.bf16.msrb.mxu3 %v656_v49 }
  0x26   :  { %v450_v0 = vrot.slane %v449_v61, 2 }
  0x28   :  { %140 = vmatpush.bf16.msra.mxu0 %v634_v7  ;;  %356 = vmatpush.bf16.msrb.mxu2 %v651_v46  ;;  %v451_v5 = vadd.f32 %v450_v0, %v449_v61 }
  0x29   :  { %394 = vmatpush.bf16.msrb.mxu3 %v655_v50 }
  0x2b   :  { %141 = vmatmul.bf16.vlgmr.msra.gmra.mxu0 %v64_v8  ;;  %v452_v8 = vrot.slane %v451_v5, 1 }
  0x2d   :  { %v453_v9 = vadd.f32 %v452_v8, %v451_v5 }
  0xa8   :  { %v142_v12 = vpop.f32.mrf.mxu0 }
  0xa9   :  { %v143_v13 = vadd.f32 %v661_v11, %v142_v12 }
  0xab   :  { %v146_v14 = vmax.f32 %v143_v13, 0.0 }
  0xad   :  { %v147_v15 = vpack.c.bf16 %v146_v14, %v146_v14 }
  0xaf   :  { %566 = vmatmul.msk.bf16.vlgmr.msra.gmra.mxu1 %vm168_vm0, %v147_v15 }
  0xb0   :  { %v144_v16 = vpop.f32.mrf.mxu0  ;;  %431 = vmatpush.bf16.msra.mxu1 %v658_v2 }
  0xb1   :  { %v483_v16 = vlaneseq }
  0xb3   :  { %v484_v18 = vand.u32 127, %v483_v16 }
  0xb4   :  { %432 = vmatpush.bf16.msra.mxu1 %v657_v4 }
  0xb5   :  { %vm485_vm3 = vcmp.lt.s32.totalorder %v484_v18, 8 }
 0x12c   :  { %v181_v22 = vpop.f32.mrf.mxu1 }
 0x12d   :  { %v182_v23 = vadd.f32 %v662_v21, %v181_v22  ;;  %v667_v21 = vld [vmem:[%s964_s14] ss:$0 sm:$0xff] }
 0x12f   :  { %v185_v24 = vmax.f32 %v182_v23, 0.0 }
 0x131   :  { %v186_v25 = vpack.c.bf16 %v185_v24, %v185_v24 }
 0x133   :  { %575 = vmatmul.msk.bf16.vlgmr.msra.gmra.mxu2 %vm168_vm0, %v186_v25 }
 0x134   :  { %v183_v26 = vpop.f32.mrf.mxu1  ;;  %471 = vmatpush.msra.mxu2 %v440_v47 }
 0x136   :  { %472 = vmatpush.msra.mxu2 %v439_v48 }
 0x1b6   :  { %v219_v31 = vpop.f32.mrf.mxu2 }
 0x1b7   :  { %v220_v32 = vadd.f32 %v663_v30, %v219_v31  ;;  %v668_v30 = vld [vmem:[%s966_s16] ss:$0 sm:$0xff] }
 0x1b9   :  { %v223_v33 = vmax.f32 %v220_v32, 0.0 }
 0x1bb   :  { %v224_v34 = vpack.c.bf16 %v223_v33, %v223_v33 }
 0x1bd   :  { %592 = vmatmul.msk.bf16.vlgmr.msra.gmra.mxu3 %vm261_vm1, %v224_v34 }
 0x1be   :  { %v221_v35 = vpop.f32.mrf.mxu2 }
 0x240   :  { %v274_v38 = vpop.f32.mrf.mxu3 }
 0x241   :  { %v275_v39 = vadd.f32 %v664_v37, %v274_v38 }
 0x243   :  { %v278_v40 = vpack.c.bf16 %v275_v39, %v275_v39  ;;  %v441_v41 = vmul.f32 %v275_v39, %v275_v39 }
 0x245   :  { %597 = vmatmul.msk.bf16.vlgmr.msrb.gmra.mxu1 %vm291_vm2, %v278_v40  ;;  %v442_v42 = vsel %vm291_vm2, %v441_v41, 0.0 }
 0x246   :  { %443 = vadd.xlane.f32.xlu0 %v442_v42 }
 0x248   :  { %v276_v43 = vpop.f32.mrf.mxu3 }
 0x2b9   :  { %v444_v10 = vpop.xlane.xlu0 %443 }
 0x2ba   :  { %v477_v12 = vadd.f32 %v453_v9, %v444_v10 }
 0x2c2   :  { %v304_v52 = vpop.f32.mrf.mxu1 }
 0x2c3   :  { %v305_v53 = vadd.f32 %v665_v51, %v304_v52 }
 0x2c5   :  { %v308_v54 = vmax.f32 %v305_v53, 0.0 }
 0x2c7   :  { %v309_v55 = vpack.c.bf16 %v308_v54, %v308_v54 }
 0x2c9   :  { %614 = vmatmul.msk.bf16.vlgmr.msrb.gmra.mxu2 %vm261_vm1, %v309_v55 }
 0x2ca   :  { %v306_v56 = vpop.f32.mrf.mxu1 }
 0x2d9   :  { %633 = vmatmul.msk.f32.vlgmr.msra.gmra.mxu2 %vm291_vm2, %v275_v39 }
 0x34c   :  { %v358_v63 = vpop.f32.mrf.mxu2 }
 0x34d   :  { %v359_v1 = vadd.f32 %v666_v62, %v358_v63 }
 0x34f   :  { %v362_v3 = vmax.f32 %v359_v1, 0.0 }
 0x351   :  { %v363_v6 = vpack.c.bf16 %v362_v3, %v362_v3 }
 0x353   :  { %623 = vmatmul.msk.bf16.vlgmr.msrb.gmra.mxu3 %vm168_vm0, %v363_v6 }
 0x354   :  { %v360_v7 = vpop.f32.mrf.mxu2 }
 0x35c   :  { %v474_v11 = vpop.f32.mrf.mxu2 }
 0x35d   :  { %v478_v13 = vmul.f32 2.0, %v474_v11 }
 0x35f   :  { %v479_v14 = vsub.f32 %v477_v12, %v478_v13 }
 0x361   :  { %v480_v15 = vmax.f32 %v479_v14, 0.0 }
 0x363   :  { %v481_v17 = vadd.f32 1.0, %v480_v15 }
 0x365   :  { %669 = vrcp.f32 %v481_v17 }
 0x36b   :  { %v670_v19 = vpop.eup %669 }
 0x36c   :  { %v488_v20 = vsel %vm485_vm3, %v670_v19, 0.0 }
 0x36d   :  { %489 = vadd.xlane.f32.xlu0 %v488_v20 }
 0x3d6   :  { %v396_v22 = vpop.f32.mrf.mxu3 }
 0x3d7   :  { %v397_v23 = vadd.f32 %v667_v21, %v396_v22 }
 0x3d9   :  { %v400_v24 = vmax.f32 %v397_v23, 0.0 }
 0x3db   :  { %v401_v25 = vpack.c.bf16 %v400_v24, %v400_v24 }
 0x3dd   :  { %632 = vmatmul.msk.bf16.vlgmr.msra.gmra.mxu1 %vm168_vm0, %v401_v25 }
 0x3de   :  { %v398_v26 = vpop.f32.mrf.mxu3 }
 0x3e0   :  { %v490_v27 = vpop.xlane.xlu0 %489 }
 0x3e1   :  { %671 = vrcp.f32 %v490_v27 }
 0x3e7   :  { %v672_v28 = vpop.eup %671 }
 0x3e8   :  { %v492_v29 = vmul.f32 %v672_v28, %v488_v20 }
 0x3ea   :  { %493 = vst [vmem:[#allocation4] sm:$0xff] %v492_v29 }
 0x3eb   :  { %515 = dma.vmem_to_hbm [thread:$0]  %s511_s0, 128, %s513_s30, [#allocation5]  }
 0x45a   :  { %v434_v31 = vpop.f32.mrf.mxu1 }
 0x45b   :  { %v435_v32 = vadd.f32 %v668_v30, %v434_v31 }
 0x45d   :  { %438 = vst [vmem:[#allocation2] sm:$0xff] %v435_v32 }
 0x45e   :  { %504 = dma.vmem_to_hbm [thread:$0]  %s500_s8, 128, %s502_s23, [#allocation3]  }
 0x462   :  { %v436_v33 = vpop.f32.mrf.mxu1 }
 0x463   :  { %721 = dma.done.wait [#allocation3], 128  }
 0x464   :  { %722 = vsyncadd [#allocation3], 4294967168 }
 0x465   :  { %723 = dma.done.wait [#allocation5], 128  }
 0x466   :  { %724 = vsyncadd [#allocation5], 4294967168 }
 0x467   :  { %524 = vsyncpa [#allocation3], 1 }
 0x468   :  { %525 = vsyncpa [#allocation5], 1 }

</bundles_post_ra>
